<compile_context>
chip_gen: v7x
topology: tpu7x:2x2x1
jax: 0.10.0
libtpu: 0.0.40
codegen_flags: <defaults>
</compile_context>

<pallas_src>
import functools

import jax
import jax.numpy as jnp
from jax.experimental import pallas as pl
from jax.experimental.pallas import tpu as pltpu  # noqa: F401  (kept for TPU-specific tuning hooks)


def _round_up(n, m):
    return ((n + m - 1) // m) * m


def mlp_kernel(x_ref, w1_ref, b1_ref, w2_ref, b2_ref, out_ref, *, num_classes):
    """Fused fc1 -> relu -> fc2 -> softmax on padded, lane-aligned tiles.

    x_ref : (Bp, Ip)   w1_ref: (Ip, Hp)   b1_ref: (1, Hp)
    w2_ref: (Hp, Op)   b2_ref: (1, Op)    out_ref: (Bp, Op)
    Only the first `num_classes` output lanes are real; the rest are padding.
    """
    x = x_ref[...]

    # ---- fc1 + ReLU (padded hidden lanes are exactly 0 after relu) ----
    h = jnp.dot(x, w1_ref[...], preferred_element_type=jnp.float32) + b1_ref[...]
    h = jnp.maximum(h, 0.0)

    # ---- fc2 ----
    logits = jnp.dot(h, w2_ref[...], preferred_element_type=jnp.float32) + b2_ref[...]

    # ---- Softmax over dim=1, masking padded lanes out of the normalizer ----
    col = jax.lax.broadcasted_iota(jnp.int32, logits.shape, dimension=1)
    logits = jnp.where(col < num_classes, logits, -jnp.inf)

    m = jnp.max(logits, axis=1, keepdims=True)
    e = jnp.exp(logits - m)                      # exp of -inf lanes -> 0
    denom = jnp.sum(e, axis=1, keepdims=True)
    out_ref[...] = (e / denom).astype(out_ref.dtype)


def preprocess_params(w1, b1, w2, b2):
    """One-time weight layout prep: transpose to (in, out) and zero-pad feature
    dims to 128-lane boundaries so the kernel sees lane-dense tiles."""
    H, I = w1.shape
    O = w2.shape[0]
    Ip, Hp, Op = _round_up(I, 128), _round_up(H, 128), _round_up(O, 128)

    w1p = jnp.zeros((Ip, Hp), jnp.float32).at[:I, :H].set(w1.T)
    b1p = jnp.zeros((1, Hp), jnp.float32).at[:, :H].set(b1)
    w2p = jnp.zeros((Hp, Op), jnp.float32).at[:H, :O].set(w2.T)
    b2p = jnp.zeros((1, Op), jnp.float32).at[:, :O].set(b2)
    return (w1p, b1p, w2p, b2p), (I, H, O)


@functools.partial(jax.jit, static_argnames=("dims",))
def simple_nn_forward(x, padded_params, dims):
    """x: (B, input_size) f32. Returns softmax probabilities (B, num_classes)."""
    w1p, b1p, w2p, b2p = padded_params
    I, H, O = dims
    B = x.shape[0]

    Bp = _round_up(B, 8)
    Ip, Hp, Op = w1p.shape[0], w1p.shape[1], w2p.shape[1]

    # Pad input once (zero rows/lanes are inert through both matmuls).
    xp = jnp.zeros((Bp, Ip), jnp.float32).at[:B, :I].set(x)

    full = lambda shape: pl.BlockSpec(shape, lambda: tuple(0 for _ in shape))

    out_padded = pl.pallas_call(
        functools.partial(mlp_kernel, num_classes=O),
        out_shape=jax.ShapeDtypeStruct((Bp, Op), jnp.float32),
        in_specs=[
            full((Bp, Ip)),
            full((Ip, Hp)), full((1, Hp)),
            full((Hp, Op)), full((1, Op)),
        ],
        out_specs=full((Bp, Op)),
    )(xp, w1p, b1p, w2p, b2p)

    return out_padded[:B, :O]


def init_params(key, input_size, hidden_size, num_classes):
    """nn.Linear default init: U(-1/sqrt(fan_in), 1/sqrt(fan_in))."""
    k1, k2, k3, k4 = jax.random.split(key, 4)
    bnd1 = 1.0 / jnp.sqrt(input_size)
    bnd2 = 1.0 / jnp.sqrt(hidden_size)
    w1 = jax.random.uniform(k1, (hidden_size, input_size), jnp.float32, -bnd1, bnd1)
    b1 = jax.random.uniform(k2, (hidden_size,), jnp.float32, -bnd1, bnd1)
    w2 = jax.random.uniform(k3, (num_classes, hidden_size), jnp.float32, -bnd2, bnd2)
    b2 = jax.random.uniform(k4, (num_classes,), jnp.float32, -bnd2, bnd2)
    return w1, b1, w2, b2


def simple_nn_ref(x, w1, b1, w2, b2):
    h = jnp.maximum(x @ w1.T + b1, 0.0)
    logits = h @ w2.T + b2
    return jax.nn.softmax(logits, axis=1)


if __name__ == "__main__":
    key = jax.random.PRNGKey(0)
    k_params, k_x = jax.random.split(key, 2)

    batch = 2
    input_size = 16
    hidden_size = 32
    num_classes = 8

    w1, b1, w2, b2 = init_params(k_params, input_size, hidden_size, num_classes)
    x = jax.random.normal(k_x, (batch, input_size), jnp.float32)

    # One-time parameter layout preprocessing (transpose + pad + could bf16-cast here).
    padded_params, dims = preprocess_params(w1, b1, w2, b2)

    probs = simple_nn_forward(x, padded_params, dims)
    jax.block_until_ready(probs)

    # Correctness check against pure-JAX reference.
    ref = simple_nn_ref(x, w1, b1, w2, b2)
    assert probs.shape == (batch, num_classes)
    assert jnp.allclose(probs, ref, atol=1e-5, rtol=1e-5)
    assert jnp.allclose(jnp.sum(probs, axis=1), jnp.ones((batch,)), atol=1e-5)

    print("KERNEL_OK")
</pallas_src>

<mosaic_0001>
module attributes {stable_mosaic.version = 11 : i64} {
  func.func @mlp_kernel(%arg0: memref<8x128xf32, #tpu.memory_space<vmem>>, %arg1: memref<128x128xf32, #tpu.memory_space<vmem>>, %arg2: memref<1x128xf32, #tpu.memory_space<vmem>>, %arg3: memref<128x128xf32, #tpu.memory_space<vmem>>, %arg4: memref<1x128xf32, #tpu.memory_space<vmem>>, %arg5: memref<8x128xf32, #tpu.memory_space<vmem>>) attributes {dimension_semantics = [], scalar_prefetch = 0 : i64, scratch_operands = 0 : i64, tpu.core_type = #tpu.core_type<tc>} {
    %c0 = arith.constant 0 : index
    %c0_0 = arith.constant 0 : index
    %0 = vector.load %arg0[%c0, %c0_0] : memref<8x128xf32, #tpu.memory_space<vmem>>, vector<8x128xf32>
    %c0_1 = arith.constant 0 : index
    %c0_2 = arith.constant 0 : index
    %1 = vector.load %arg1[%c0_1, %c0_2] : memref<128x128xf32, #tpu.memory_space<vmem>>, vector<128x128xf32>
    %cst = arith.constant dense<0.000000e+00> : vector<8x128xf32>
    %2 = tpu.matmul %0, %1, %cst {dimension_numbers = #tpu.dot_dimension_numbers<[1], [0], [0], [1], [0, 0, 1, 1], [], []>} : vector<8x128xf32>, vector<128x128xf32>, vector<8x128xf32> -> vector<8x128xf32>
    %c0_3 = arith.constant 0 : index
    %c0_4 = arith.constant 0 : index
    %3 = vector.load %arg2[%c0_3, %c0_4] : memref<1x128xf32, #tpu.memory_space<vmem>>, vector<1x128xf32>
    %4 = vector.broadcast %3 : vector<1x128xf32> to vector<8x128xf32>
    %5 = arith.addf %2, %4 : vector<8x128xf32>
    %cst_5 = arith.constant 0.000000e+00 : f32
    %6 = vector.broadcast %cst_5 : f32 to vector<8x128xf32>
    %7 = arith.maximumf %5, %6 : vector<8x128xf32>
    %c0_6 = arith.constant 0 : index
    %c0_7 = arith.constant 0 : index
    %8 = vector.load %arg3[%c0_6, %c0_7] : memref<128x128xf32, #tpu.memory_space<vmem>>, vector<128x128xf32>
    %cst_8 = arith.constant dense<0.000000e+00> : vector<8x128xf32>
    %9 = tpu.matmul %7, %8, %cst_8 {dimension_numbers = #tpu.dot_dimension_numbers<[1], [0], [0], [1], [0, 0, 1, 1], [], []>} : vector<8x128xf32>, vector<128x128xf32>, vector<8x128xf32> -> vector<8x128xf32>
    %c0_9 = arith.constant 0 : index
    %c0_10 = arith.constant 0 : index
    %10 = vector.load %arg4[%c0_9, %c0_10] : memref<1x128xf32, #tpu.memory_space<vmem>>, vector<1x128xf32>
    %11 = vector.broadcast %10 : vector<1x128xf32> to vector<8x128xf32>
    %12 = arith.addf %9, %11 : vector<8x128xf32>
    %13 = tpu.iota {dimensions = array<i32: 1>} : vector<8x128xi32>
    %c8_i32 = arith.constant 8 : i32
    %14 = vector.broadcast %c8_i32 : i32 to vector<8x128xi32>
    %15 = arith.cmpi slt, %13, %14 : vector<8x128xi32>
    %cst_11 = arith.constant 0xFF800000 : f32
    %16 = vector.broadcast %cst_11 : f32 to vector<8x128xf32>
    %17 = arith.select %15, %12, %16 : vector<8x128xi1>, vector<8x128xf32>
    %cst_12 = arith.constant dense<0xFF800000> : vector<8xf32>
    %18 = vector.multi_reduction <maximumf>, %17, %cst_12 [1] : vector<8x128xf32> to vector<8xf32>
    %19 = vector.shape_cast %18 : vector<8xf32> to vector<8x1xf32>
    %20 = vector.broadcast %19 : vector<8x1xf32> to vector<8x128xf32>
    %21 = arith.subf %17, %20 : vector<8x128xf32>
    %22 = math.exp %21 : vector<8x128xf32>
    %cst_13 = arith.constant dense<0.000000e+00> : vector<8xf32>
    %23 = vector.multi_reduction <add>, %22, %cst_13 [1] : vector<8x128xf32> to vector<8xf32>
    %24 = vector.shape_cast %23 : vector<8xf32> to vector<8x1xf32>
    %25 = vector.broadcast %24 : vector<8x1xf32> to vector<8x128xf32>
    %26 = arith.divf %22, %25 : vector<8x128xf32>
    %c0_14 = arith.constant 0 : index
    %c0_15 = arith.constant 0 : index
    %27 = vector.load %arg5[%c0_14, %c0_15] : memref<8x128xf32, #tpu.memory_space<vmem>>, vector<8x128xf32>
    tpu.vector_store %arg5[%c0_14, %c0_15], %26 {strides = array<i32>} : memref<8x128xf32, #tpu.memory_space<vmem>>, vector<8x128xf32>,
    return
  }
}

</mosaic_0001>

<bundles_post_ra>
// kernel: simple_nn_forward.1
= control target key start
LH: loop header
LB: loop body
LE: loop exit
PB: predicated region body
PF: predicated region fallthrough
CT: control target
= control target key end

     0   :  { %10 = vsyncpa [#allocation3], 0  ;;  %s558_s0 = inlined_call_operand.vmem [shape: f32[8,128], index: 0, kind: input, shape index: {}]   ;;  %s559_s1 = inlined_call_operand.hbm [shape: f32[128,128], index: 1, kind: input, shape index: {}]   ;;  %s560_s2 = inlined_call_operand.vmem [shape: f32[1,128], index: 2, kind: input, shape index: {}]   ;;  %s561_s3 = inlined_call_operand.hbm [shape: f32[128,128], index: 3, kind: input, shape index: {}]   ;;  %s562_s4 = inlined_call_operand.vmem [shape: f32[1,128], index: 4, kind: input, shape index: {}]   ;;  %s563_s5 = inlined_call_operand.vmem [shape: f32[8,128], index: 5, kind: output, shape index: {}]  }
   0x1   :  { %11 = vsyncpa [#allocation5], 0  ;;  %s469_s18 = smov [#allocation2]   ;;  %s421_s22 = scalar_lea.hbm %s559_s1, 2048 }
   0x2   :  { %s19_s19 = sshll.u32 %s469_s18, 4  ;;  %p422_p0 = scmp.ne.s32.totalorder %s559_s1, %s421_s22  ;;  %s20_s19 = int_to_ptr.vmem [resolvable:$true] %s19_s19 }
   0x3   :  { %p425_p1 = scmp.lt.u32.totalorder %s421_s22, %s559_s1 }
   0x5   :  { %p427_p2 = pnand %p425_p1, %p422_p0 }
   0x7   :  { %430 = shalt.err (!%p427_p2)
}
   0x8   :  { %s431_s27 = scalar_lea.vmem %s20_s19, 2048  ;;  %p436_p4 = scmp.lt.s32.totalorder %s20_s19, %s20_s19 }
   0x9   :  { %p432_p3 = scmp.ne.s32.totalorder %s20_s19, %s431_s27  ;;  %p437_p5 = scmp.lt.s32.totalorder %s431_s27, %s431_s27 }
   0xb   :  { %p438_p6 = por %p437_p5, %p436_p4 }
   0xd   :  { %p439_p7 = pnand %p438_p6, %p432_p3 }
   0xf   :  { %442 = shalt.err (!%p439_p7)
}
  0x10   :  { %s470_s28 = smov 128   ;;  %s471_s29 = smov 8  }
  0x11   :  { %25 = dma.hbm_to_vmem [thread:$0]  %s559_s1, 2048, %s20_s19, [#allocation3], %s470_s28, %s470_s28, %s471_s29  }
  0x12   :  { %s472_s7 = smov [#allocation4]   ;;  %s443_s11 = scalar_lea.hbm %s561_s3, 2048 }
  0x13   :  { %s33_s8 = sshll.u32 %s472_s7, 4  ;;  %p444_p8 = scmp.ne.s32.totalorder %s561_s3, %s443_s11  ;;  %s34_s8 = int_to_ptr.vmem [resolvable:$true] %s33_s8 }
  0x14   :  { %p447_p9 = scmp.lt.u32.totalorder %s443_s11, %s561_s3 }
  0x16   :  { %p449_p10 = pnand %p447_p9, %p444_p8 }
  0x18   :  { %452 = shalt.err (!%p449_p10)
}
  0x19   :  { %s453_s16 = scalar_lea.vmem %s34_s8, 2048  ;;  %p458_p12 = scmp.lt.s32.totalorder %s34_s8, %s34_s8 }
  0x1a   :  { %p454_p11 = scmp.ne.s32.totalorder %s34_s8, %s453_s16  ;;  %p459_p13 = scmp.lt.s32.totalorder %s453_s16, %s453_s16 }
  0x1c   :  { %p460_p0 = por %p459_p13, %p458_p12 }
  0x1e   :  { %p461_p1 = pnand %p460_p0, %p454_p11 }
  0x20   :  { %464 = shalt.err (!%p461_p1)
}
  0x21   :  { %39 = dma.hbm_to_vmem [thread:$0]  %s561_s3, 2048, %s34_s8, [#allocation5], %s470_s28, %s470_s28, %s471_s29  }
  0x22   :  { %465 = dma.done.wait [#allocation3], 2048  }
  0x23   :  { %466 = vsyncadd [#allocation3], 4294965248 }
  0x24   :  { %467 = dma.done.wait [#allocation5], 2048  }
  0x25   :  { %468 = vsyncadd [#allocation5], 4294965248  ;;  %v473_v0 = vmov 0.0|0.0   ;;  %vm474_vm0 = vmmov 0   ;;  %v475_v1 = vmov 0.0   ;;  %v49_v2 = vld [vmem:[#allocation2] sm:$0xff]  ;;  %v236_v56 = vlaneseq }
  0x26   :  { %362 = vmatprep.subr.bf16.mxu0 %v473_v0  ;;  %324 = vmatprep.mubr.msk.f32.mxu0 %vm474_vm0, %v475_v1  ;;  %v50_v3 = vld [vmem:[#allocation2 + $0x8] sm:$0xff]  ;;  %v51_v4 = vld [vmem:[#allocation2 + $0x10] sm:$0xff]  ;;  %v52_v6 = vld [vmem:[#allocation2 + $0x18] sm:$0xff] }
  0x27   :  { %386 = vmatprep.subr.bf16.mxu1 %v473_v0  ;;  %359 = vmatprep.mubr.msk.f32.mxu1 %vm474_vm0, %v475_v1  ;;  %v363_v5 = vpack.c.bf16 %v50_v3, %v49_v2  ;;  %v366_v7 = vpack.c.bf16 %v52_v6, %v51_v4  ;;  %v53_v8 = vld [vmem:[#allocation2 + $0x20] sm:$0xff]  ;;  %v54_v9 = vld [vmem:[#allocation2 + $0x28] sm:$0xff]  ;;  %v145_v12 = vld [vmem:[#allocation4 + $0x10] sm:$0xff]  ;;  %v237_v57 = vand.u32 127, %v236_v56 }
  0x28   :  { %v143_v10 = vld [vmem:[#allocation4] sm:$0xff]  ;;  %v144_v11 = vld [vmem:[#allocation4 + $0x8] sm:$0xff]  ;;  %v146_v13 = vld [vmem:[#allocation4 + $0x18] sm:$0xff]  ;;  %v369_v14 = vpack.c.bf16 %v54_v9, %v53_v8 }
  0x29   :  { %364 = vmatpush3.bf16.msra.mxu0 %v363_v5  ;;  %v387_v15 = vpack.c.bf16 %v144_v11, %v143_v10  ;;  %v55_v16 = vld [vmem:[#allocation2 + $0x30] sm:$0xff]  ;;  %v56_v17 = vld [vmem:[#allocation2 + $0x38] sm:$0xff]  ;;  %v390_v18 = vpack.c.bf16 %v146_v13, %v145_v12  ;;  %v147_v19 = vld [vmem:[#allocation4 + $0x20] sm:$0xff]  ;;  %vm238_vm1 = vcmp.lt.s32.totalorder %v237_v57, 8 }
  0x2a   :  { %365 = vmatprep.subr.bf16.mxu0 %v473_v0  ;;  %v148_v20 = vld [vmem:[#allocation4 + $0x28] sm:$0xff]  ;;  %v372_v21 = vpack.c.bf16 %v56_v17, %v55_v16  ;;  %v57_v22 = vld [vmem:[#allocation2 + $0x40] sm:$0xff]  ;;  %v149_v25 = vld [vmem:[#allocation4 + $0x30] sm:$0xff] }
  0x2b   :  { %388 = vmatpush3.bf16.msra.mxu1 %v387_v15  ;;  %v58_v23 = vld [vmem:[#allocation2 + $0x48] sm:$0xff]  ;;  %v393_v24 = vpack.c.bf16 %v148_v20, %v147_v19  ;;  %v150_v26 = vld [vmem:[#allocation4 + $0x38] sm:$0xff]  ;;  %v59_v28 = vld [vmem:[#allocation2 + $0x50] sm:$0xff] }
  0x2c   :  { %389 = vmatprep.subr.bf16.mxu1 %v473_v0  ;;  %v375_v27 = vpack.c.bf16 %v58_v23, %v57_v22  ;;  %v60_v29 = vld [vmem:[#allocation2 + $0x58] sm:$0xff]  ;;  %v396_v30 = vpack.c.bf16 %v150_v26, %v149_v25  ;;  %v151_v31 = vld [vmem:[#allocation4 + $0x40] sm:$0xff]  ;;  %v152_v32 = vld [vmem:[#allocation4 + $0x48] sm:$0xff] }
  0x2d   :  { %367 = vmatpush3.bf16.msra.mxu0 %v366_v7  ;;  %v378_v33 = vpack.c.bf16 %v60_v29, %v59_v28  ;;  %v61_v34 = vld [vmem:[#allocation2 + $0x60] sm:$0xff]  ;;  %v62_v35 = vld [vmem:[#allocation2 + $0x68] sm:$0xff]  ;;  %v399_v36 = vpack.c.bf16 %v152_v32, %v151_v31  ;;  %v153_v37 = vld [vmem:[#allocation4 + $0x50] sm:$0xff] }
  0x2e   :  { %368 = vmatprep.subr.bf16.mxu0 %v473_v0  ;;  %v154_v38 = vld [vmem:[#allocation4 + $0x58] sm:$0xff]  ;;  %v381_v39 = vpack.c.bf16 %v62_v35, %v61_v34  ;;  %v63_v40 = vld [vmem:[#allocation2 + $0x70] sm:$0xff]  ;;  %v155_v43 = vld [vmem:[#allocation4 + $0x60] sm:$0xff] }
  0x2f   :  { %391 = vmatpush3.bf16.msra.mxu1 %v390_v18  ;;  %v64_v41 = vld [vmem:[#allocation2 + $0x78] sm:$0xff]  ;;  %v402_v42 = vpack.c.bf16 %v154_v38, %v153_v37  ;;  %v156_v44 = vld [vmem:[#allocation4 + $0x68] sm:$0xff]  ;;  %v48_v47 = vld [vmem:[%s558_s0] sm:$0xff] }
  0x30   :  { %392 = vmatprep.subr.bf16.mxu1 %v473_v0  ;;  %v384_v45 = vpack.c.bf16 %v64_v41, %v63_v40  ;;  %v405_v46 = vpack.c.bf16 %v156_v44, %v155_v43  ;;  %v157_v48 = vld [vmem:[#allocation4 + $0x70] sm:$0xff]  ;;  %v158_v49 = vld [vmem:[#allocation4 + $0x78] sm:$0xff]  ;;  %v256_v51 = vld [vmem:[%s560_s2] ss:$0 sm:$0xff] }
  0x31   :  { %370 = vmatpush3.bf16.msra.mxu0 %v369_v14  ;;  %v408_v50 = vpack.c.bf16 %v158_v49, %v157_v48  ;;  %v257_v58 = vld [vmem:[%s562_s4] ss:$0 sm:$0xff] }
  0x32   :  { %371 = vmatprep.subr.bf16.mxu0 %v473_v0 }
  0x33   :  { %394 = vmatpush3.bf16.msra.mxu1 %v393_v24 }
  0x34   :  { %395 = vmatprep.subr.bf16.mxu1 %v473_v0 }
  0x35   :  { %373 = vmatpush3.bf16.msra.mxu0 %v372_v21 }
  0x36   :  { %374 = vmatprep.subr.bf16.mxu0 %v473_v0 }
  0x37   :  { %397 = vmatpush3.bf16.msra.mxu1 %v396_v30 }
  0x38   :  { %398 = vmatprep.subr.bf16.mxu1 %v473_v0 }
  0x39   :  { %376 = vmatpush3.bf16.msra.mxu0 %v375_v27 }
  0x3a   :  { %377 = vmatprep.subr.bf16.mxu0 %v473_v0 }
  0x3b   :  { %400 = vmatpush3.bf16.msra.mxu1 %v399_v36 }
  0x3c   :  { %401 = vmatprep.subr.bf16.mxu1 %v473_v0 }
  0x3d   :  { %379 = vmatpush3.bf16.msra.mxu0 %v378_v33 }
  0x3e   :  { %380 = vmatprep.subr.bf16.mxu0 %v473_v0 }
  0x3f   :  { %403 = vmatpush3.bf16.msra.mxu1 %v402_v42 }
  0x40   :  { %404 = vmatprep.subr.bf16.mxu1 %v473_v0 }
  0x41   :  { %382 = vmatpush3.bf16.msra.mxu0 %v381_v39 }
  0x42   :  { %383 = vmatprep.subr.bf16.mxu0 %v473_v0 }
  0x43   :  { %406 = vmatpush3.bf16.msra.mxu1 %v405_v46 }
  0x44   :  { %407 = vmatprep.subr.bf16.mxu1 %v473_v0 }
  0x45   :  { %385 = vmatpush3.bf16.msra.mxu0 %v384_v45 }
  0x47   :  { %409 = vmatpush3.bf16.msra.mxu1 %v408_v50 }
  0x48   :  { %325 = vmatmul.mubr.f32.vlgmr.msra.gmra.mrb[0].mxu0 %v48_v47 }
 0x11b   :  { %v138_v52 = vpop.f32.mrb[0].mxu0 }
 0x11c   :  { %v139_v53 = vadd.f32 %v256_v51, %v138_v52  ;;  %v326_v54 = vpop.f32.mrb[1].mxu0 }
 0x11e   :  { %v142_v55 = vmax.f32 %v139_v53, 0.0 }
 0x120   :  { %360 = vmatmul.mubr.f32.vlgmr.msra.gmra.mrb[0].mxu1 %v142_v55 }
 0x1f3   :  { %v232_v59 = vpop.f32.mrb[0].mxu1 }
 0x1f4   :  { %v233_v60 = vadd.f32 %v257_v58, %v232_v59  ;;  %v361_v61 = vpop.f32.mrb[1].mxu1 }
 0x1f6   :  { %v239_v62 = vsel %vm238_vm1, %v233_v60, -inf }
 0x1f7   :  { %240 = vmax.xlane.f32.xlu0 %v239_v62 }
 0x284   :  { %v241_v63 = vpop.xlane.xlu0 %240 }
 0x285   :  { %v242_v0 = vsub.f32 %v239_v62, %v241_v63 }
 0x287   :  { %v243_v1 = vmul.f32 1.442695, %v242_v0 }
 0x289   :  { %417 = vpow2.f32 %v243_v1 }
 0x293   :  { %v418_v2 = vpop.eup %417 }
 0x294   :  { %245 = vadd.xlane.f32.xlu0 %v418_v2 }
 0x321   :  { %v246_v3 = vpop.xlane.xlu0 %245 }
 0x322   :  { %419 = vrcp.f32 %v246_v3 }
 0x32c   :  { %v420_v4 = vpop.eup %419 }
 0x32d   :  { %v248_v5 = vmul.f32 %v420_v4, %v418_v2 }
 0x32f   :  { %249 = vst [vmem:[%s563_s5] sm:$0xff] %v248_v5 }
 0x330   :  { %254 = vsyncpa [#allocation3], 1 }
 0x331   :  { %255 = vsyncpa [#allocation5], 1 }

</bundles_post_ra>
